<compile_context>
chip_gen: v7x
topology: tpu7x:2x2x1
jax: 0.10.0
libtpu: 0.0.40
codegen_flags: <defaults>
</compile_context>

<pallas_src>
import functools

import jax
import jax.numpy as jnp
from jax.experimental import pallas as pl
from jax.experimental.pallas import tpu as pltpu


_LANE = 128
_SUBLANE = 8
# 48 MiB fits v7x's 64 MiB physical VMEM with headroom; v5e/v6e (128 MiB) can
# raise this together with max_row_tile (e.g. 96 MiB + tm=16384 on v6e).
_DEFAULT_VMEM_CAP_BYTES = 48 * 1024 * 1024


def _round_up(x: int, m: int) -> int:
    return ((x + m - 1) // m) * m


def _padded_lanes(d: int) -> int:
    """Every VMEM buffer pads its last dim to 128 lanes."""
    return _round_up(d, _LANE)


# ----------------------------------------------------------------------------
# Kernel
# ----------------------------------------------------------------------------
def _fused_mlp_kernel(x_ref, *refs, num_layers: int):
    """One row tile: h = x; per layer h = h @ W + b, ReLU on all but the last.

    Strictly row-wise: garbage rows of a partial last tile are computed but
    never written back, so they cannot corrupt the output.
    """
    o_ref = refs[-1]
    h = x_ref[...]
    for i in range(num_layers):
        w = refs[2 * i][...]              # (d_in_i, d_out_i), VMEM-resident
        b = refs[2 * i + 1][...]          # (1, d_out_i), broadcasts over rows
        h = jnp.dot(h, w, preferred_element_type=jnp.float32) + b
        if i != num_layers - 1:
            h = jnp.maximum(h, 0.0)
    o_ref[...] = h.astype(o_ref.dtype)


# ----------------------------------------------------------------------------
# Tiling / VMEM budgeting
# ----------------------------------------------------------------------------
def _vmem_footprint_bytes(tm: int, d_in: int, layer_out_dims, x_itemsize: int) -> int:
    """Lane-padded VMEM footprint estimate for one grid step.

    - x tile: double-buffered (streamed over the grid)
    - out tile: double-buffered
    - per-layer activation temporaries: Mosaic materializes them in VMEM
      (they do not stay in vregs once tm * 128 lanes exceeds the vreg file)
    - weights/biases: tiny, single-buffered; covered by the fixed margin.
    """
    x_tile = 2 * tm * _padded_lanes(d_in) * x_itemsize
    out_tile = 2 * tm * _padded_lanes(layer_out_dims[-1]) * 4
    temps = sum(tm * _padded_lanes(d) * 4 for d in layer_out_dims)
    margin = 2 * 1024 * 1024
    return x_tile + out_tile + temps + margin


def _choose_row_tile(m: int, d_in: int, layer_out_dims, x_itemsize: int,
                     max_row_tile: int, vmem_cap_bytes: int) -> int:
    """Row tile: at most ceil(m/2) (>=2 grid steps -> both v7x TCs busy),
    capped by max_row_tile, shrunk until the padded footprint fits VMEM."""
    tm = max(_SUBLANE, min(max_row_tile, _round_up(-(-m // 2), _SUBLANE)))
    while tm > _SUBLANE and _vmem_footprint_bytes(
            tm, d_in, layer_out_dims, x_itemsize) > vmem_cap_bytes:
        tm = max(_SUBLANE, _round_up(tm // 2, _SUBLANE))
    return tm


def _resident_spec(shape):
    """Constant-index (VMEM-resident) BlockSpec; single-buffered if supported."""
    if hasattr(pl, "Buffered"):
        try:
            return pl.BlockSpec(shape, lambda i: (0, 0), pipeline_mode=pl.Buffered(1))
        except TypeError:
            pass  # older BlockSpec signature without pipeline_mode
    return pl.BlockSpec(shape, lambda i: (0, 0))


# ----------------------------------------------------------------------------
# Wrapper
# ----------------------------------------------------------------------------
def fc_block_forward(x: jax.Array, params, *,
                     max_row_tile: int = 8192,
                     vmem_cap_bytes: int = _DEFAULT_VMEM_CAP_BYTES,
                     stream_bf16: bool = False,
                     min_rows_for_pallas: int = 0) -> jax.Array:
    """Run the whole FC block as one fused Pallas kernel, tiled over rows."""
    orig_shape = x.shape
    d_in = orig_shape[-1]
    x2d = x.reshape(-1, d_in)
    m = x2d.shape[0]
    num_layers = len(params)
    layer_out_dims = [w.shape[1] for w, _ in params]
    d_out = layer_out_dims[-1]
    out_dtype = x2d.dtype

    if m < min_rows_for_pallas:
        # Tiny batches are kernel-dispatch bound; XLA fuses this 3-layer MLP
        # fine.  (Production: set min_rows_for_pallas ~ 2048.)
        h = x2d
        for i, (w, b) in enumerate(params):
            h = h @ w + b
            if i != num_layers - 1:
                h = jnp.maximum(h, 0.0)
        return h.astype(out_dtype).reshape(*orig_shape[:-1], d_out)

    if stream_bf16:
        # Halves x HBM traffic / x VMEM tile; f32 accumulation is kept by
        # preferred_element_type in the kernel.
        x2d = x2d.astype(jnp.bfloat16)
        params = [(w.astype(jnp.bfloat16), b) for w, b in params]

    x_itemsize = jnp.dtype(x2d.dtype).itemsize
    tm = _choose_row_tile(m, d_in, layer_out_dims, x_itemsize,
                          max_row_tile, vmem_cap_bytes)
    grid = (pl.cdiv(m, tm),)

    in_specs = [pl.BlockSpec((tm, d_in), lambda i: (i, 0))]   # streamed x tile
    flat_args = [x2d]
    for w, b in params:
        di, do = w.shape
        in_specs.append(_resident_spec((di, do)))             # full W, resident
        in_specs.append(_resident_spec((1, do)))              # full bias
        flat_args.append(w)
        flat_args.append(b)

    footprint = _vmem_footprint_bytes(tm, d_in, layer_out_dims, x_itemsize)
    vmem_limit = int(min(vmem_cap_bytes, max(2 * footprint, 32 * 1024 * 1024)))

    out = pl.pallas_call(
        functools.partial(_fused_mlp_kernel, num_layers=num_layers),
        out_shape=jax.ShapeDtypeStruct((m, d_out), out_dtype),
        grid_spec=pltpu.PrefetchScalarGridSpec(
            num_scalar_prefetch=0,
            grid=grid,
            in_specs=in_specs,
            # NOTE: d_out (=8 here) < 128 lanes -> masked stores + 16x padded
            # out buffer in VMEM; output volume is tiny so we accept it, but
            # it is counted in the VMEM footprint above.
            out_specs=pl.BlockSpec((tm, d_out), lambda i: (i, 0)),
        ),
        compiler_params=pltpu.CompilerParams(
            dimension_semantics=("parallel",),   # shard row tiles on v7x's 2 TCs
            vmem_limit_bytes=vmem_limit,
        ),
    )(*flat_args)
    return out.reshape(*orig_shape[:-1], d_out)


# ----------------------------------------------------------------------------
# Module
# ----------------------------------------------------------------------------
class FCBlock3:
    """JAX/Pallas re-implementation of _FCBlock3 (ReLU on all but last layer)."""

    def __init__(self, in_features: int, units=None, bias: bool = True,
                 key: jax.Array | None = None,
                 max_row_tile: int = 8192,
                 vmem_cap_bytes: int = _DEFAULT_VMEM_CAP_BYTES,
                 stream_bf16: bool = False,
                 min_rows_for_pallas: int = 0):
        units = [1] if units is None else list(units)
        in_feats = [in_features] + units[:-1]
        if key is None:
            key = jax.random.PRNGKey(0)
        self.params = []
        for d_in, d_out in zip(in_feats, units):
            key, kw, kb = jax.random.split(key, 3)
            bound = 1.0 / jnp.sqrt(jnp.float32(d_in))
            # Stored already transposed vs. PyTorch nn.Linear: (in, out).
            w = jax.random.uniform(kw, (d_in, d_out), jnp.float32, -bound, bound)
            if bias:
                b = jax.random.uniform(kb, (1, d_out), jnp.float32, -bound, bound)
            else:
                b = jnp.zeros((1, d_out), jnp.float32)
            self.params.append((w, b))
        self.num_layers = len(self.params)
        self._forward = jax.jit(functools.partial(
            fc_block_forward,
            max_row_tile=max_row_tile,
            vmem_cap_bytes=vmem_cap_bytes,
            stream_bf16=stream_bf16,
            min_rows_for_pallas=min_rows_for_pallas,
        ))

    def __call__(self, x: jax.Array) -> jax.Array:
        return self._forward(x, self.params)


def _reference(x: jax.Array, params) -> jax.Array:
    """Plain-JAX reference (same math as the PyTorch module)."""
    n = len(params)
    for i, (w, b) in enumerate(params):
        x = x @ w + b
        if i != n - 1:
            x = jnp.maximum(x, 0.0)
    return x


if __name__ == "__main__":
    key = jax.random.PRNGKey(0)
    kx2, kx3, kx4, kparams = jax.random.split(key, 4)

    in_features = 32
    units = [64, 48, 8]

    model = FCBlock3(in_features=in_features, units=units, bias=True, key=kparams)

    # Case 1: (batch, d)
    x2 = jax.random.normal(kx2, (10, in_features), jnp.float32)
    y2 = jax.block_until_ready(model(x2))
    assert y2.shape == (10, units[-1]), y2.shape

    # Case 2: (batch, group_size, d)
    x3 = jax.random.normal(kx3, (2, 4, in_features), jnp.float32)
    y3 = jax.block_until_ready(model(x3))
    assert y3.shape == (2, 4, units[-1]), y3.shape

    # Case 3: larger row count -> multi-step grid with a partial last tile.
    x4 = jax.random.normal(kx4, (4100, in_features), jnp.float32)
    y4 = jax.block_until_ready(model(x4))
    assert y4.shape == (4100, units[-1]), y4.shape

    # Correctness checks against the pure-JAX reference.
    ref2 = _reference(x2, model.params)
    ref3 = _reference(x3.reshape(-1, in_features), model.params).reshape(2, 4, -1)
    ref4 = _reference(x4, model.params)
    assert jnp.allclose(y2, ref2, atol=1e-5, rtol=1e-5)
    assert jnp.allclose(y3, ref3, atol=1e-5, rtol=1e-5)
    assert jnp.allclose(y4, ref4, atol=1e-4, rtol=1e-4)

    print("KERNEL_OK")
</pallas_src>

<mosaic_0001>
module attributes {stable_mosaic.version = 11 : i64} {
  func.func @_fused_mlp_kernel(%arg0: i32, %arg1: memref<8x32xf32, #tpu.memory_space<vmem>>, %arg2: memref<32x64xf32, #tpu.memory_space<vmem>>, %arg3: memref<1x64xf32, #tpu.memory_space<vmem>>, %arg4: memref<64x48xf32, #tpu.memory_space<vmem>>, %arg5: memref<1x48xf32, #tpu.memory_space<vmem>>, %arg6: memref<48x8xf32, #tpu.memory_space<vmem>>, %arg7: memref<1x8xf32, #tpu.memory_space<vmem>>, %arg8: memref<8x8xf32, #tpu.memory_space<vmem>>) attributes {dimension_semantics = [#tpu.dimension_semantics<parallel>], iteration_bounds = array<i64: 2>, scalar_prefetch = 0 : i64, scratch_operands = 0 : i64, tpu.core_type = #tpu.core_type<tc>, window_params = [{transform_indices = @transform_0, window_bounds = array<i64: 8, 32>}, {pipeline_mode = #tpu.pipeline_mode<synchronous>, transform_indices = @transform_1, window_bounds = array<i64: 32, 64>}, {pipeline_mode = #tpu.pipeline_mode<synchronous>, transform_indices = @transform_2, window_bounds = array<i64: 1, 64>}, {pipeline_mode = #tpu.pipeline_mode<synchronous>, transform_indices = @transform_3, window_bounds = array<i64: 64, 48>}, {pipeline_mode = #tpu.pipeline_mode<synchronous>, transform_indices = @transform_4, window_bounds = array<i64: 1, 48>}, {pipeline_mode = #tpu.pipeline_mode<synchronous>, transform_indices = @transform_5, window_bounds = array<i64: 48, 8>}, {pipeline_mode = #tpu.pipeline_mode<synchronous>, transform_indices = @transform_6, window_bounds = array<i64: 1, 8>}, {transform_indices = @transform_7, window_bounds = array<i64: 8, 8>}]} {
    %c0 = arith.constant 0 : index
    %c0_0 = arith.constant 0 : index
    %0 = vector.load %arg1[%c0, %c0_0] : memref<8x32xf32, #tpu.memory_space<vmem>>, vector<8x32xf32>
    %c0_1 = arith.constant 0 : index
    %c0_2 = arith.constant 0 : index
    %1 = vector.load %arg2[%c0_1, %c0_2] : memref<32x64xf32, #tpu.memory_space<vmem>>, vector<32x64xf32>
    %c0_3 = arith.constant 0 : index
    %c0_4 = arith.constant 0 : index
    %2 = vector.load %arg3[%c0_3, %c0_4] : memref<1x64xf32, #tpu.memory_space<vmem>>, vector<1x64xf32>
    %cst = arith.constant dense<0.000000e+00> : vector<8x64xf32>
    %3 = tpu.matmul %0, %1, %cst {dimension_numbers = #tpu.dot_dimension_numbers<[1], [0], [0], [1], [0, 0, 1, 1], [], []>} : vector<8x32xf32>, vector<32x64xf32>, vector<8x64xf32> -> vector<8x64xf32>
    %4 = vector.broadcast %2 : vector<1x64xf32> to vector<8x64xf32>
    %5 = arith.addf %3, %4 : vector<8x64xf32>
    %cst_5 = arith.constant 0.000000e+00 : f32
    %6 = vector.broadcast %cst_5 : f32 to vector<8x64xf32>
    %7 = arith.maximumf %5, %6 : vector<8x64xf32>
    %c0_6 = arith.constant 0 : index
    %c0_7 = arith.constant 0 : index
    %8 = vector.load %arg4[%c0_6, %c0_7] : memref<64x48xf32, #tpu.memory_space<vmem>>, vector<64x48xf32>
    %c0_8 = arith.constant 0 : index
    %c0_9 = arith.constant 0 : index
    %9 = vector.load %arg5[%c0_8, %c0_9] : memref<1x48xf32, #tpu.memory_space<vmem>>, vector<1x48xf32>
    %cst_10 = arith.constant dense<0.000000e+00> : vector<8x48xf32>
    %10 = tpu.matmul %7, %8, %cst_10 {dimension_numbers = #tpu.dot_dimension_numbers<[1], [0], [0], [1], [0, 0, 1, 1], [], []>} : vector<8x64xf32>, vector<64x48xf32>, vector<8x48xf32> -> vector<8x48xf32>
    %11 = vector.broadcast %9 : vector<1x48xf32> to vector<8x48xf32>
    %12 = arith.addf %10, %11 : vector<8x48xf32>
    %cst_11 = arith.constant 0.000000e+00 : f32
    %13 = vector.broadcast %cst_11 : f32 to vector<8x48xf32>
    %14 = arith.maximumf %12, %13 : vector<8x48xf32>
    %c0_12 = arith.constant 0 : index
    %c0_13 = arith.constant 0 : index
    %15 = vector.load %arg6[%c0_12, %c0_13] : memref<48x8xf32, #tpu.memory_space<vmem>>, vector<48x8xf32>
    %c0_14 = arith.constant 0 : index
    %c0_15 = arith.constant 0 : index
    %16 = vector.load %arg7[%c0_14, %c0_15] : memref<1x8xf32, #tpu.memory_space<vmem>>, vector<1x8xf32>
    %cst_16 = arith.constant dense<0.000000e+00> : vector<8x8xf32>
    %17 = tpu.matmul %14, %15, %cst_16 {dimension_numbers = #tpu.dot_dimension_numbers<[1], [0], [0], [1], [0, 0, 1, 1], [], []>} : vector<8x48xf32>, vector<48x8xf32>, vector<8x8xf32> -> vector<8x8xf32>
    %18 = vector.broadcast %16 : vector<1x8xf32> to vector<8x8xf32>
    %19 = arith.addf %17, %18 : vector<8x8xf32>
    %c0_17 = arith.constant 0 : index
    %c0_18 = arith.constant 0 : index
    %20 = vector.load %arg8[%c0_17, %c0_18] : memref<8x8xf32, #tpu.memory_space<vmem>>, vector<8x8xf32>
    tpu.vector_store %arg8[%c0_17, %c0_18], %19 {strides = array<i32>} : memref<8x8xf32, #tpu.memory_space<vmem>>, vector<8x8xf32>,
    return
  }
  func.func @transform_0(%arg0: i32) -> (i32, i32) {
    %c0_i32 = arith.constant 0 : i32
    %c0_i32_0 = arith.constant 0 : i32
    return %arg0, %c0_i32 : i32, i32
  }
  func.func @transform_1(%arg0: i32) -> (i32, i32) {
    %c0_i32 = arith.constant 0 : i32
    %c0_i32_0 = arith.constant 0 : i32
    %c0_i32_1 = arith.constant 0 : i32
    return %c0_i32, %c0_i32_0 : i32, i32
  }
  func.func @transform_2(%arg0: i32) -> (i32, i32) {
    %c0_i32 = arith.constant 0 : i32
    %c0_i32_0 = arith.constant 0 : i32
    %c0_i32_1 = arith.constant 0 : i32
    return %c0_i32, %c0_i32_0 : i32, i32
  }
  func.func @transform_3(%arg0: i32) -> (i32, i32) {
    %c0_i32 = arith.constant 0 : i32
    %c0_i32_0 = arith.constant 0 : i32
    %c0_i32_1 = arith.constant 0 : i32
    return %c0_i32, %c0_i32_0 : i32, i32
  }
  func.func @transform_4(%arg0: i32) -> (i32, i32) {
    %c0_i32 = arith.constant 0 : i32
    %c0_i32_0 = arith.constant 0 : i32
    %c0_i32_1 = arith.constant 0 : i32
    return %c0_i32, %c0_i32_0 : i32, i32
  }
  func.func @transform_5(%arg0: i32) -> (i32, i32) {
    %c0_i32 = arith.constant 0 : i32
    %c0_i32_0 = arith.constant 0 : i32
    %c0_i32_1 = arith.constant 0 : i32
    return %c0_i32, %c0_i32_0 : i32, i32
  }
  func.func @transform_6(%arg0: i32) -> (i32, i32) {
    %c0_i32 = arith.constant 0 : i32
    %c0_i32_0 = arith.constant 0 : i32
    %c0_i32_1 = arith.constant 0 : i32
    return %c0_i32, %c0_i32_0 : i32, i32
  }
  func.func @transform_7(%arg0: i32) -> (i32, i32) {
    %c0_i32 = arith.constant 0 : i32
    %c0_i32_0 = arith.constant 0 : i32
    return %arg0, %c0_i32 : i32, i32
  }
}

</mosaic_0001>

<bundles_post_ra>
// kernel: fc_block_forward.1
= control target key start
LH: loop header
LB: loop body
LE: loop exit
PB: predicated region body
PF: predicated region fallthrough
CT: control target
= control target key end

     0   :  { %s763_s24 = smov 0   ;;  %s853_s0 = inlined_call_operand.vmem [shape: f32[10,32], index: 0, kind: input, shape index: {}]   ;;  %s854_s1 = inlined_call_operand.vmem [shape: f32[32,64], index: 1, kind: input, shape index: {}]   ;;  %s855_s2 = inlined_call_operand.vmem [shape: f32[1,64], index: 2, kind: input, shape index: {}]   ;;  %s856_s3 = inlined_call_operand.vmem [shape: f32[64,48], index: 3, kind: input, shape index: {}]   ;;  %s857_s4 = inlined_call_operand.vmem [shape: f32[1,48], index: 4, kind: input, shape index: {}]   ;;  %s858_s5 = inlined_call_operand.vmem [shape: f32[48,8], index: 5, kind: input, shape index: {}]   ;;  %s859_s6 = inlined_call_operand.vmem [shape: f32[1,8], index: 6, kind: input, shape index: {}]   ;;  %s860_s7 = inlined_call_operand.vmem [shape: f32[10,8], index: 7, kind: output, shape index: {}]  }
   0x1 LB: > { %s593_s25 = sadd.s32 4294967295, %s718_s24   ;;  %p597_p0 = scmp.ge.s32.totalorder %s718_s24, 1  ;;  %s718_s24 = sphi %s763_s24, %s17_s24  }
   0x2   : > { %p236_p1 = scmp.lt.s32.totalorder %s718_s24, 3 }
   0x4   : > { %p237_p2 = pnand %p597_p0, %p236_p1 }
   0x5   : > { %v275_v0 = vld [vmem:[%s854_s1] sm:$0xff] (!%p237_p2)  ;;  %v276_v1 = vld [vmem:[%s854_s1 + $0x8] sm:$0xff] (!%p237_p2)  ;;  %v277_v2 = vld [vmem:[%s854_s1 + $0x10] sm:$0xff] (!%p237_p2)  ;;  %v720_v3 = vmov (!%p237_p2), 0.0|0.0   ;;  %vm721_vm0 = vmmov (!%p237_p2), 0   ;;  %v722_v6 = vmov (!%p237_p2), 0.0  }
   0x6   : > { %240 = sbr.rel (%p237_p2) target bundleno = 664 (0x298), region = 48  ;;  %674 = vmatprep.subr.bf16.mxu0 (!%p237_p2), %v720_v3  ;;  %v675_v4 = vpack.c.bf16 (!%p237_p2), %v276_v1, %v275_v0  ;;  %v278_v5 = vld [vmem:[%s854_s1 + $0x18] sm:$0xff] (!%p237_p2)  ;;  %637 = vmatprep.mubr.msk.f32.mxu0 (!%p237_p2), %vm721_vm0, %v722_v6  ;;  %p266_p3 = scmp.lt.s32.totalorder (!%p237_p2), %s593_s25, 1  ;;  %v361_v7 = vld [vmem:[%s856_s3] sm:$0xff] (!%p237_p2)  ;;  %v362_v8 = vld [vmem:[%s856_s3 + $0x8] sm:$0xff] (!%p237_p2)  ;;  %vm286_vm1 = vcmask (!%p237_p2), 261120  }
   0x7   : > { %680 = vmatprep.subr.bf16.mxu1 (!%p237_p2), %v720_v3  ;;  %v681_v9 = vpack.c.bf16 (!%p237_p2), %v362_v8, %v361_v7  ;;  %v363_v10 = vld [vmem:[%s856_s3 + $0x10] sm:$0xff] (!%p237_p2)  ;;  %v364_v11 = vld [vmem:[%s856_s3 + $0x18] sm:$0xff] (!%p237_p2)  ;;  %656 = vmatprep.mubr.msk.f32.mxu1 (!%p237_p2), %vm721_vm0, %v722_v6  ;;  %v678_v12 = vpack.c.bf16 (!%p237_p2), %v278_v5, %v277_v2  ;;  %v365_v14 = vld [vmem:[%s856_s3 + $0x20] sm:$0xff] (!%p237_p2)  ;;  %vm376_vm2 = vcmask (!%p237_p2), 523264   ;;  %vm464_vm3 = vcmask (!%p237_p2), 392192  }
   0x8   : > { %676 = vmatpush3.bf16.msra.mxu0 (!%p237_p2), %v675_v4  ;;  %v684_v13 = vpack.c.bf16 (!%p237_p2), %v364_v11, %v363_v10  ;;  %v366_v15 = vld [vmem:[%s856_s3 + $0x28] sm:$0xff] (!%p237_p2)  ;;  %v367_v18 = vld [vmem:[%s856_s3 + $0x30] sm:$0xff] (!%p237_p2)  ;;  %v368_v19 = vld [vmem:[%s856_s3 + $0x38] sm:$0xff] (!%p237_p2)  ;;  %vm538_vm4 = vcmask (!%p237_p2), 64512  }
   0x9   : > { %677 = vmatprep.subr.bf16.mxu0 (!%p237_p2), %v720_v3  ;;  %682 = vmatpush3.bf16.msra.mxu1 (!%p237_p2), %v681_v9  ;;  %v687_v17 = vpack.c.bf16 (!%p237_p2), %v366_v15, %v365_v14  ;;  %v690_v20 = vpack.c.bf16 (!%p237_p2), %v368_v19, %v367_v18  ;;  %v451_v21 = vld [vmem:[%s858_s5] sm:$0xff] (!%p237_p2)  ;;  %v452_v22 = vld [vmem:[%s858_s5 + $0x8] sm:$0xff] (!%p237_p2)  ;;  %v453_v23 = vld [vmem:[%s858_s5 + $0x10] sm:$0xff] (!%p237_p2) }
   0xa   : > { %683 = vmatprep.subr.bf16.mxu1 (!%p237_p2), %v720_v3  ;;  %v693_v24 = vpack.c.bf16 (!%p237_p2), %v452_v22, %v451_v21  ;;  %v454_v25 = vld [vmem:[%s858_s5 + $0x18] sm:$0xff] (!%p237_p2)  ;;  %v600_v27 = vld [vmem:[%s855_s2] ss:$0 sm:$0xff] (!%p237_p2)  ;;  %v456_v33 = vld [vmem:[%s858_s5 + $0x28] sm:$0xff] (!%p237_p2) }
   0xb   : > { %v696_v26 = vpack.c.bf16 (!%p237_p2), %v454_v25, %v453_v23  ;;  %v455_v32 = vld [vmem:[%s858_s5 + $0x20] sm:$0xff] (!%p237_p2) }
   0xc   : > { %679 = vmatpush3.bf16.msra.mxu0 (!%p237_p2), %v678_v12  ;;  %v699_v34 = vpack.c.bf16 (!%p237_p2), %v456_v33, %v455_v32  ;;  %v602_v35 = vld [vmem:[%s857_s4] ss:$0 sm:$0xff] (!%p237_p2) }
   0xd   : > { %s862_s25 = smov (!%p266_p3, %s593_s25), 1  ;;  %685 = vmatpush3.bf16.msra.mxu1 %v684_v13  ;;  %692 = vmatprep.subr.bf16.mxu0 %v720_v3  ;;  %v604_v40 = vld [vmem:[%s859_s6] ss:$0 sm:$0xff] }
   0xe   : > { %s598_s19 = sshll.u32 %s862_s25, 3  ;;  %686 = vmatprep.subr.bf16.mxu1 %v720_v3 }
   0xf   : > { %s269_s28 = scalar_lea.vmem %s853_s0, %s598_s19  ;;  %s273_s10 = scalar_lea.vmem %s860_s7, %s598_s19 }
  0x10   : > { %v274_v16 = vld [vmem:[%s269_s28] sm:$0xff] }
  0x11   : > { %638 = vmatmul.mubr.msk.f32.vlgmr.msra.gmra.mrb[0].mxu0 %vm286_vm1, %v274_v16  ;;  %688 = vmatpush3.bf16.msra.mxu1 %v687_v17 }
  0x12   : > { %671 = vmatprep.mubr.msk.f32.mxu0 %vm721_vm0, %v722_v6  ;;  %689 = vmatprep.subr.bf16.mxu1 %v720_v3 }
  0x13   : > { %694 = vmatpush3.bf16.msra.mxu0 %v693_v24 }
  0x14   : > { %695 = vmatprep.subr.bf16.mxu0 %v720_v3 }
  0x15   : > { %691 = vmatpush3.bf16.msra.mxu1 %v690_v20 }
  0x17   : > { %697 = vmatpush3.bf16.msra.mxu0 %v696_v26 }
  0x18   : > { %698 = vmatprep.subr.bf16.mxu0 %v720_v3 }
  0x1b   : > { %700 = vmatpush3.bf16.msra.mxu0 %v699_v34 }
  0xe4   : > { %v356_v28 = vpop.f32.mrb[0].mxu0 }
  0xe5   : > { %v357_v29 = vadd.f32 %v600_v27, %v356_v28  ;;  %v639_v30 = vpop.f32.mrb[1].mxu0 }
  0xe7   : > { %v360_v31 = vmax.f32 %v357_v29, 0.0 }
  0xe9   : > { %657 = vmatmul.mubr.msk.f32.vlgmr.msra.gmra.mrb[0].mxu1 %vm376_vm2, %v360_v31 }
 0x1bc   : > { %v446_v36 = vpop.f32.mrb[0].mxu1 }
 0x1bd   : > { %v447_v37 = vadd.f32 %v602_v35, %v446_v36  ;;  %v658_v38 = vpop.f32.mrb[1].mxu1 }
 0x1bf   : > { %v450_v39 = vmax.f32 %v447_v37, 0.0 }
 0x1c1   : > { %672 = vmatmul.mubr.msk.f32.vlgmr.msra.gmra.mrb[2].mxu0 %vm464_vm3, %v450_v39 }
 0x294   : > { %v534_v41 = vpop.f32.mrb[2].mxu0 }
 0x295   : > { %v535_v42 = vadd.f32 %v604_v40, %v534_v41  ;;  %v673_v43 = vpop.f32.mrb[3].mxu0 }
 0x297   : > { %539 = vst.msk [vmem:[%s273_s10] sm:$0xff] %vm538_vm4, %v535_v42 }
 0x298 PF: > { %s17_s24 = sadd.s32 1, %s718_s24  }
 0x299   : > { %p14_p4 = scmp.ge.s32.totalorder %s17_s24, 4  }
 0x29b   :  { %16 = sbr.rel (!%p14_p4) target bundleno = 1 (0x1), region = 78 }

</bundles_post_ra>
